<compile_context>
chip_gen: v7x
topology: tpu7x:2x2x1
jax: 0.10.0
libtpu: 0.0.40
codegen_flags: <defaults>
</compile_context>

<pallas_src>
import jax
import jax.numpy as jnp
from jax.experimental import pallas as pl
from jax.experimental.pallas import tpu as pltpu


def _copy_relevance_kernel(r_ref, out_ref):
    # Pure pass-through of the relevance block (identical semantics to the
    # PyTorch module, which returns `r` unmodified).
    out_ref[...] = r_ref[...]


def _lane_dense_layout(total: int):
    """Pick (rows, cols) with cols a multiple of 128 when possible."""
    for cols in (2048, 1024, 512, 256, 128):
        if total % cols == 0:
            return total // cols, cols
    # Fallback: single row, block equals the full array (still legal).
    return 1, total


def _row_tile(rows: int, cols: int, itemsize: int):
    """Largest row tile (multiple of 8, dividing rows) under ~2 MiB/block."""
    target_rows = max(1, (2 * 1024 * 1024) // (cols * itemsize))
    if target_rows >= rows:
        return rows  # whole slab fits in one comfortably small block
    for tr in (1024, 512, 256, 128, 64, 32, 16, 8):
        if tr <= target_rows and rows % tr == 0:
            return tr
    return rows  # no clean divisor -> single full-array block


@jax.jit
def relevance_propagation_elu(a: jax.Array, r: jax.Array) -> jax.Array:
    """LRP for ELU: relevance is passed through unchanged.

    a: activations (unused, kept for API parity with the PyTorch module)
    r: relevance tensor
    returns: relevance, same shape/dtype as r
    """
    assert a.shape == r.shape, "activation / relevance shape mismatch"
    del a  # never touched on-device: no HBM read, no VMEM buffering

    orig_shape = r.shape
    total = 1
    for d in orig_shape:
        total *= d

    rows, cols = _lane_dense_layout(total)
    tile_rows = _row_tile(rows, cols, r.dtype.itemsize)
    grid = (rows // tile_rows,)

    r2 = r.reshape(rows, cols)

    out2 = pl.pallas_call(
        _copy_relevance_kernel,
        out_shape=jax.ShapeDtypeStruct((rows, cols), r.dtype),
        grid=grid,
        in_specs=[pl.BlockSpec((tile_rows, cols), lambda i: (i, 0))],
        out_specs=pl.BlockSpec((tile_rows, cols), lambda i: (i, 0)),
        # Output aliases the relevance slab: when XLA can alias, no extra HBM
        # output buffer / write-back is allocated for this identity op.
        input_output_aliases={0: 0},
        compiler_params=pltpu.CompilerParams(
            dimension_semantics=("parallel",),
        ),
    )(r2)

    return out2.reshape(orig_shape)


if __name__ == "__main__":
    key = jax.random.PRNGKey(0)
    ka, kr = jax.random.split(key)

    # Small NCHW shapes consistent with a conv-net LRP pass.
    shape = (2, 4, 16, 16)
    a = jax.random.normal(ka, shape, dtype=jnp.float32)
    r = jax.random.normal(kr, shape, dtype=jnp.float32)

    out = relevance_propagation_elu(a, r)
    out = jax.block_until_ready(out)

    # Semantics check: forward returns r unmodified.
    assert out.shape == r.shape and out.dtype == r.dtype
    assert bool(jnp.array_equal(out, r))

    print("KERNEL_OK")
</pallas_src>

<mosaic_0001>
module attributes {stable_mosaic.version = 11 : i64} {
  func.func @_copy_relevance_kernel(%arg0: i32, %arg1: memref<1x2048xf32, #tpu.memory_space<vmem>>, %arg2: memref<1x2048xf32, #tpu.memory_space<vmem>>) attributes {dimension_semantics = [#tpu.dimension_semantics<parallel>], iteration_bounds = array<i64: 1>, scalar_prefetch = 0 : i64, scratch_operands = 0 : i64, tpu.core_type = #tpu.core_type<tc>, window_params = [{transform_indices = @transform_0, window_bounds = array<i64: 1, 2048>}, {transform_indices = @transform_1, window_bounds = array<i64: 1, 2048>}]} {
    %c0 = arith.constant 0 : index
    %c0_0 = arith.constant 0 : index
    %0 = vector.load %arg1[%c0, %c0_0] : memref<1x2048xf32, #tpu.memory_space<vmem>>, vector<1x2048xf32>
    %c0_1 = arith.constant 0 : index
    %c0_2 = arith.constant 0 : index
    %1 = vector.load %arg2[%c0_1, %c0_2] : memref<1x2048xf32, #tpu.memory_space<vmem>>, vector<1x2048xf32>
    tpu.vector_store %arg2[%c0_1, %c0_2], %0 {strides = array<i32>} : memref<1x2048xf32, #tpu.memory_space<vmem>>, vector<1x2048xf32>,
    return
  }
  func.func @transform_0(%arg0: i32) -> (i32, i32) {
    %c0_i32 = arith.constant 0 : i32
    %c0_i32_0 = arith.constant 0 : i32
    return %arg0, %c0_i32 : i32, i32
  }
  func.func @transform_1(%arg0: i32) -> (i32, i32) {
    %c0_i32 = arith.constant 0 : i32
    %c0_i32_0 = arith.constant 0 : i32
    return %arg0, %c0_i32 : i32, i32
  }
}

</mosaic_0001>

<bundles_post_ra>
// kernel: relevance_propagation_elu.1
= control target key start
LH: loop header
LB: loop body
LE: loop exit
PB: predicated region body
PF: predicated region fallthrough
CT: control target
= control target key end

     0   :  { %s38_s0 = inlined_call_operand.vmem [shape: f32[1,2048], index: 0, kind: input, shape index: {}, may-alias: {0,1}]   ;;  %s39_s1 = inlined_call_operand.vmem [shape: f32[1,2048], index: 1, kind: output, shape index: {}, may-alias: {0,1}]  }
   0x1   :  { %v8_v0 = vld [vmem:[%s38_s0] sm:$0xff]  ;;  %v9_v1 = vld [vmem:[%s38_s0 + $0x8] sm:$0xff] }
   0x2   :  { %10 = vst [vmem:[%s39_s1] sm:$0xff] %v8_v0  ;;  %11 = vst [vmem:[%s39_s1 + $0x8] sm:$0xff] %v9_v1 }

</bundles_post_ra>
